<compile_context>
chip_gen: v7x
topology: tpu7x:2x2x1
jax: 0.10.0
libtpu: 0.0.40
codegen_flags: <defaults>
</compile_context>

<pallas_src>
import math

import jax
import jax.numpy as jnp
from jax.experimental import pallas as pl
from jax.experimental.pallas import tpu as pltpu

# Small test configuration (consistent with MultiLayer(hidden_dim, num_head, inner_dim))
B = 2          # batch
S = 8          # sequence length
H = 32         # hidden_dim
NH = 4         # num_head  (H % NH == 0)
HD = H // NH   # head dim
INNER = 64     # inner_dim
EPS = 1e-5     # nn.LayerNorm default eps

# MXU operand dtype.  Keep f32 at this toy size; on v6e/v7x with real H/INNER
# (multiples of 128) set to jnp.bfloat16 (v5e: only the MXU benefits from bf16).
MXU_DTYPE = jnp.float32


def _layernorm(x, gamma, beta):
    mu = jnp.mean(x, axis=-1, keepdims=True)
    var = jnp.mean((x - mu) ** 2, axis=-1, keepdims=True)
    return (x - mu) * jax.lax.rsqrt(var + EPS) * gamma + beta


def _gelu(x):
    # TODO(synk): PyTorch nn.GELU() defaults to the exact erf form; the tanh
    # approximation is used here (FFN internals are not shown in the spec), diff ~1e-3.
    c = math.sqrt(2.0 / math.pi)
    return 0.5 * x * (1.0 + jnp.tanh(c * (x + 0.044715 * x * x * x)))


def multilayer_kernel(x_ref, wqkv_ref, wo_ref, w1_ref, w2_ref, vec_ref, o_ref):
    # One grid step == one batch element: x_ref is (S, H).
    x = x_ref[...].astype(jnp.float32)            # (S, H)

    vecs = vec_ref[...]                           # (8, 128) packed small vectors
    bqkv = vecs[0:1, :3 * H]                      # (1, 3H)  q|k|v biases
    bo   = vecs[1:2, :H]
    g1   = vecs[2:3, :H]
    be1  = vecs[3:4, :H]
    b1   = vecs[4:5, :INNER]
    b2   = vecs[5:6, :H]
    g2   = vecs[6:7, :H]
    be2  = vecs[7:8, :H]

    # ---- fused Q/K/V projection: ONE lane-dense 2D matmul -------------------
    qkv = jnp.dot(x.astype(MXU_DTYPE), wqkv_ref[...].astype(MXU_DTYPE),
                  preferred_element_type=jnp.float32) + bqkv        # (S, 3H)

    # ---- per-head attention (static loop, lane slices of width HD) ----------
    # TODO(synk): optional attention `mask` argument not plumbed (forward uses mask=None).
    scale = 1.0 / math.sqrt(HD)
    ctx_parts = []
    for hh in range(NH):
        qh = qkv[:, 0 * H + hh * HD: 0 * H + (hh + 1) * HD]         # (S, HD)
        kh = qkv[:, 1 * H + hh * HD: 1 * H + (hh + 1) * HD]         # (S, HD)
        vh = qkv[:, 2 * H + hh * HD: 2 * H + (hh + 1) * HD]         # (S, HD)
        s = jnp.einsum("qd,kd->qk", qh.astype(MXU_DTYPE), kh.astype(MXU_DTYPE),
                       preferred_element_type=jnp.float32) * scale  # (S, S)
        m = jnp.max(s, axis=-1, keepdims=True)
        p = jnp.exp(s - m)
        p = p * pl.reciprocal(jnp.sum(p, axis=-1, keepdims=True), approx=True)
        ctx_parts.append(jnp.dot(p.astype(MXU_DTYPE), vh.astype(MXU_DTYPE),
                                 preferred_element_type=jnp.float32))
    ctx = jnp.concatenate(ctx_parts, axis=-1)                       # (S, H)

    # ---- output projection: ONE (S,H)@(H,H) matmul ---------------------------
    mha = jnp.dot(ctx.astype(MXU_DTYPE), wo_ref[...].astype(MXU_DTYPE),
                  preferred_element_type=jnp.float32) + bo          # (S, H)

    # ---- residual + dropout1 (identity at inference) + LayerNorm1 ------------
    y = _layernorm(x + mha, g1, be1)

    # ---- FFN -----------------------------------------------------------------
    h1 = jnp.dot(y.astype(MXU_DTYPE), w1_ref[...].astype(MXU_DTYPE),
                 preferred_element_type=jnp.float32) + b1
    h1 = _gelu(h1)
    h2 = jnp.dot(h1.astype(MXU_DTYPE), w2_ref[...].astype(MXU_DTYPE),
                 preferred_element_type=jnp.float32) + b2

    # ---- residual + dropout2 (identity at inference) + LayerNorm2 ------------
    o_ref[...] = _layernorm(y + h2, g2, be2).astype(o_ref.dtype)


def multilayer_forward(x, params):
    b, s, h = x.shape
    assert (s, h) == (S, H)

    # ---------- host-side one-time re-packing (free, outside the kernel) ----------
    wqkv = jnp.concatenate([params["wq"], params["wk"], params["wv"]], axis=1)  # (H, 3H)
    bqkv = jnp.concatenate([params["bq"], params["bk"], params["bv"]], axis=1)  # (1, 3H)

    # Pack the 8 tiny vectors into a single (8, 128) tile -> one DMA.
    # (Requires 3H <= 128 and INNER <= 128; at real sizes pass them separately.)
    vecs = jnp.zeros((8, 128), jnp.float32)
    vecs = vecs.at[0, :3 * h].set(bqkv.reshape(-1))
    vecs = vecs.at[1, :h].set(params["bo"].reshape(-1))
    vecs = vecs.at[2, :h].set(params["g1"].reshape(-1))
    vecs = vecs.at[3, :h].set(params["be1"].reshape(-1))
    vecs = vecs.at[4, :INNER].set(params["b1"].reshape(-1))
    vecs = vecs.at[5, :h].set(params["b2"].reshape(-1))
    vecs = vecs.at[6, :h].set(params["g2"].reshape(-1))
    vecs = vecs.at[7, :h].set(params["be2"].reshape(-1))

    # ---------- advisory cost estimate for the XLA scheduler ----------
    flops = 2 * b * s * (3 * h * h          # fused QKV projection
                         + 2 * s * h        # scores + PV (all heads)
                         + h * h            # output projection
                         + 2 * h * INNER)   # FFN
    transcendentals = b * (NH * s * s + s * INNER + 4 * s)
    bytes_accessed = 4 * (2 * x.size + wqkv.size + params["wo"].size +
                          params["w1"].size + params["w2"].size + vecs.size)

    def const_spec(blk):
        return pl.BlockSpec(blk, lambda bb: (0,) * len(blk))   # fetched once, stays resident

    out = pl.pallas_call(
        multilayer_kernel,
        out_shape=jax.ShapeDtypeStruct((b, s, h), x.dtype),
        grid=(b,),
        in_specs=[
            pl.BlockSpec((None, s, h), lambda bb: (bb, 0, 0)),  # x: one batch element
            const_spec((h, 3 * h)),                             # wqkv
            const_spec((h, h)),                                 # wo
            const_spec((h, INNER)),                             # w1
            const_spec((INNER, h)),                             # w2
            const_spec((8, 128)),                               # packed small vectors
        ],
        out_specs=pl.BlockSpec((None, s, h), lambda bb: (bb, 0, 0)),
        compiler_params=pltpu.CompilerParams(
            dimension_semantics=("parallel",)),                 # both TCs on v7x
        cost_estimate=pl.CostEstimate(flops=flops,
                                      transcendentals=transcendentals,
                                      bytes_accessed=bytes_accessed),
    )(x, wqkv, params["wo"], params["w1"], params["w2"], vecs)

    return out


def make_params(key):
    ks = jax.random.split(key, 6)

    def lin(k, fan_in, fan_out):
        bound = 1.0 / math.sqrt(fan_in)
        kw, kb = jax.random.split(k)
        w = jax.random.uniform(kw, (fan_in, fan_out), jnp.float32, -bound, bound)
        b = jax.random.uniform(kb, (1, fan_out), jnp.float32, -bound, bound)
        return w, b

    wq, bq = lin(ks[0], H, H)
    wk, bk = lin(ks[1], H, H)
    wv, bv = lin(ks[2], H, H)
    wo, bo = lin(ks[3], H, H)
    w1, b1 = lin(ks[4], H, INNER)
    w2, b2 = lin(ks[5], INNER, H)
    return dict(
        wq=wq, bq=bq, wk=wk, bk=bk, wv=wv, bv=bv, wo=wo, bo=bo,
        g1=jnp.ones((1, H), jnp.float32), be1=jnp.zeros((1, H), jnp.float32),
        w1=w1, b1=b1, w2=w2, b2=b2,
        g2=jnp.ones((1, H), jnp.float32), be2=jnp.zeros((1, H), jnp.float32),
    )


def reference_forward(x, p):
    """Pure-JAX reference of the same forward pass (operates on the unpacked params)."""
    q = x @ p["wq"] + p["bq"]
    k = x @ p["wk"] + p["bk"]
    v = x @ p["wv"] + p["bv"]

    def heads(t):
        return t.reshape(t.shape[0], t.shape[1], NH, HD).transpose(0, 2, 1, 3)

    qh, kh, vh = heads(q), heads(k), heads(v)
    s = jnp.einsum("bhqd,bhkd->bhqk", qh, kh) / math.sqrt(HD)
    a = jax.nn.softmax(s, axis=-1)
    o = jnp.einsum("bhqk,bhkd->bhqd", a, vh).transpose(0, 2, 1, 3).reshape(x.shape)
    o = o @ p["wo"] + p["bo"]
    y = _layernorm(x + o, p["g1"], p["be1"])
    h1 = _gelu(y @ p["w1"] + p["b1"])
    h2 = h1 @ p["w2"] + p["b2"]
    return _layernorm(y + h2, p["g2"], p["be2"])


if __name__ == "__main__":
    key = jax.random.PRNGKey(0)
    kx, kp = jax.random.split(key)
    x = jax.random.normal(kx, (B, S, H), jnp.float32)
    params = make_params(kp)

    out = multilayer_forward(x, params)
    out = jax.block_until_ready(out)

    ref = reference_forward(x, params)
    assert out.shape == (B, S, H)
    # tolerance allows for the approx-reciprocal softmax denominator (~2^-12 relative)
    assert jnp.max(jnp.abs(out - ref)) < 5e-3, "mismatch vs pure-JAX reference"
    print("KERNEL_OK")
</pallas_src>

<mosaic_0001>
module attributes {stable_mosaic.version = 11 : i64} {
  func.func @multilayer_kernel(%arg0: i32, %arg1: memref<1x8x32xf32, #tpu.memory_space<vmem>>, %arg2: memref<32x96xf32, #tpu.memory_space<vmem>>, %arg3: memref<32x32xf32, #tpu.memory_space<vmem>>, %arg4: memref<32x64xf32, #tpu.memory_space<vmem>>, %arg5: memref<64x32xf32, #tpu.memory_space<vmem>>, %arg6: memref<8x128xf32, #tpu.memory_space<vmem>>, %arg7: memref<1x8x32xf32, #tpu.memory_space<vmem>>) attributes {dimension_semantics = [#tpu.dimension_semantics<parallel>], iteration_bounds = array<i64: 2>, scalar_prefetch = 0 : i64, scratch_operands = 0 : i64, tpu.core_type = #tpu.core_type<tc>, window_params = [{transform_indices = @transform_0, window_bounds = array<i64: 1, 8, 32>}, {pipeline_mode = #tpu.pipeline_mode<synchronous>, transform_indices = @transform_1, window_bounds = array<i64: 32, 96>}, {pipeline_mode = #tpu.pipeline_mode<synchronous>, transform_indices = @transform_2, window_bounds = array<i64: 32, 32>}, {pipeline_mode = #tpu.pipeline_mode<synchronous>, transform_indices = @transform_3, window_bounds = array<i64: 32, 64>}, {pipeline_mode = #tpu.pipeline_mode<synchronous>, transform_indices = @transform_4, window_bounds = array<i64: 64, 32>}, {pipeline_mode = #tpu.pipeline_mode<synchronous>, transform_indices = @transform_5, window_bounds = array<i64: 8, 128>}, {transform_indices = @transform_6, window_bounds = array<i64: 1, 8, 32>}]} {
    %c0 = arith.constant 0 : index
    %c0_0 = arith.constant 0 : index
    %c0_1 = arith.constant 0 : index
    %0 = vector.load %arg1[%c0, %c0_0, %c0_1] : memref<1x8x32xf32, #tpu.memory_space<vmem>>, vector<1x8x32xf32>
    %1 = vector.shape_cast %0 : vector<1x8x32xf32> to vector<8x32xf32>
    %c0_2 = arith.constant 0 : index
    %c0_3 = arith.constant 0 : index
    %2 = vector.load %arg6[%c0_2, %c0_3] : memref<8x128xf32, #tpu.memory_space<vmem>>, vector<8x128xf32>
    %3 = vector.extract_strided_slice %2 {offsets = [0, 0], sizes = [1, 96], strides = [1, 1]} : vector<8x128xf32> to vector<1x96xf32>
    %4 = vector.extract_strided_slice %2 {offsets = [1, 0], sizes = [1, 32], strides = [1, 1]} : vector<8x128xf32> to vector<1x32xf32>
    %5 = vector.extract_strided_slice %2 {offsets = [2, 0], sizes = [1, 32], strides = [1, 1]} : vector<8x128xf32> to vector<1x32xf32>
    %6 = vector.extract_strided_slice %2 {offsets = [3, 0], sizes = [1, 32], strides = [1, 1]} : vector<8x128xf32> to vector<1x32xf32>
    %7 = vector.extract_strided_slice %2 {offsets = [4, 0], sizes = [1, 64], strides = [1, 1]} : vector<8x128xf32> to vector<1x64xf32>
    %8 = vector.extract_strided_slice %2 {offsets = [5, 0], sizes = [1, 32], strides = [1, 1]} : vector<8x128xf32> to vector<1x32xf32>
    %9 = vector.extract_strided_slice %2 {offsets = [6, 0], sizes = [1, 32], strides = [1, 1]} : vector<8x128xf32> to vector<1x32xf32>
    %10 = vector.extract_strided_slice %2 {offsets = [7, 0], sizes = [1, 32], strides = [1, 1]} : vector<8x128xf32> to vector<1x32xf32>
    %c0_4 = arith.constant 0 : index
    %c0_5 = arith.constant 0 : index
    %11 = vector.load %arg2[%c0_4, %c0_5] : memref<32x96xf32, #tpu.memory_space<vmem>>, vector<32x96xf32>
    %cst = arith.constant dense<0.000000e+00> : vector<8x96xf32>
    %12 = tpu.matmul %1, %11, %cst {dimension_numbers = #tpu.dot_dimension_numbers<[1], [0], [0], [1], [0, 0, 1, 1], [], []>} : vector<8x32xf32>, vector<32x96xf32>, vector<8x96xf32> -> vector<8x96xf32>
    %13 = vector.broadcast %3 : vector<1x96xf32> to vector<8x96xf32>
    %14 = arith.addf %12, %13 : vector<8x96xf32>
    %15 = vector.extract_strided_slice %14 {offsets = [0, 0], sizes = [8, 8], strides = [1, 1]} : vector<8x96xf32> to vector<8x8xf32>
    %16 = vector.extract_strided_slice %14 {offsets = [0, 32], sizes = [8, 8], strides = [1, 1]} : vector<8x96xf32> to vector<8x8xf32>
    %17 = vector.extract_strided_slice %14 {offsets = [0, 64], sizes = [8, 8], strides = [1, 1]} : vector<8x96xf32> to vector<8x8xf32>
    "tpu.trace_start"() <{level = 10 : i32, message = "qd,kd->qk"}> : () -> ()
    %cst_6 = arith.constant dense<0.000000e+00> : vector<8x8xf32>
    %18 = tpu.matmul %15, %16, %cst_6 {dimension_numbers = #tpu.dot_dimension_numbers<[1], [1], [0], [0], [0, 0, 1, 0], [], []>} : vector<8x8xf32>, vector<8x8xf32>, vector<8x8xf32> -> vector<8x8xf32>
    "tpu.trace_stop"() : () -> ()
    %cst_7 = arith.constant 0.353553385 : f32
    %19 = vector.broadcast %cst_7 : f32 to vector<8x8xf32>
    %20 = arith.mulf %18, %19 : vector<8x8xf32>
    %cst_8 = arith.constant dense<0xFF800000> : vector<8xf32>
    %21 = vector.multi_reduction <maximumf>, %20, %cst_8 [1] : vector<8x8xf32> to vector<8xf32>
    %22 = vector.shape_cast %21 : vector<8xf32> to vector<8x1xf32>
    %23 = vector.broadcast %22 : vector<8x1xf32> to vector<8x8xf32>
    %24 = arith.subf %20, %23 : vector<8x8xf32>
    %25 = math.exp %24 : vector<8x8xf32>
    %cst_9 = arith.constant dense<0.000000e+00> : vector<8xf32>
    %26 = vector.multi_reduction <add>, %25, %cst_9 [1] : vector<8x8xf32> to vector<8xf32>
    %27 = vector.shape_cast %26 : vector<8xf32> to vector<8x1xf32>
    %28 = tpu.reciprocal %27 {approx = true} : vector<8x1xf32> -> vector<8x1xf32>
    %29 = vector.broadcast %28 : vector<8x1xf32> to vector<8x8xf32>
    %30 = arith.mulf %25, %29 : vector<8x8xf32>
    %cst_10 = arith.constant dense<0.000000e+00> : vector<8x8xf32>
    %31 = tpu.matmul %30, %17, %cst_10 {dimension_numbers = #tpu.dot_dimension_numbers<[1], [0], [0], [1], [0, 0, 1, 1], [], []>} : vector<8x8xf32>, vector<8x8xf32>, vector<8x8xf32> -> vector<8x8xf32>
    %32 = vector.extract_strided_slice %14 {offsets = [0, 8], sizes = [8, 8], strides = [1, 1]} : vector<8x96xf32> to vector<8x8xf32>
    %33 = vector.extract_strided_slice %14 {offsets = [0, 40], sizes = [8, 8], strides = [1, 1]} : vector<8x96xf32> to vector<8x8xf32>
    %34 = vector.extract_strided_slice %14 {offsets = [0, 72], sizes = [8, 8], strides = [1, 1]} : vector<8x96xf32> to vector<8x8xf32>
    "tpu.trace_start"() <{level = 10 : i32, message = "qd,kd->qk"}> : () -> ()
    %cst_11 = arith.constant dense<0.000000e+00> : vector<8x8xf32>
    %35 = tpu.matmul %32, %33, %cst_11 {dimension_numbers = #tpu.dot_dimension_numbers<[1], [1], [0], [0], [0, 0, 1, 0], [], []>} : vector<8x8xf32>, vector<8x8xf32>, vector<8x8xf32> -> vector<8x8xf32>
    "tpu.trace_stop"() : () -> ()
    %cst_12 = arith.constant 0.353553385 : f32
    %36 = vector.broadcast %cst_12 : f32 to vector<8x8xf32>
    %37 = arith.mulf %35, %36 : vector<8x8xf32>
    %cst_13 = arith.constant dense<0xFF800000> : vector<8xf32>
    %38 = vector.multi_reduction <maximumf>, %37, %cst_13 [1] : vector<8x8xf32> to vector<8xf32>
    %39 = vector.shape_cast %38 : vector<8xf32> to vector<8x1xf32>
    %40 = vector.broadcast %39 : vector<8x1xf32> to vector<8x8xf32>
    %41 = arith.subf %37, %40 : vector<8x8xf32>
    %42 = math.exp %41 : vector<8x8xf32>
    %cst_14 = arith.constant dense<0.000000e+00> : vector<8xf32>
    %43 = vector.multi_reduction <add>, %42, %cst_14 [1] : vector<8x8xf32> to vector<8xf32>
    %44 = vector.shape_cast %43 : vector<8xf32> to vector<8x1xf32>
    %45 = tpu.reciprocal %44 {approx = true} : vector<8x1xf32> -> vector<8x1xf32>
    %46 = vector.broadcast %45 : vector<8x1xf32> to vector<8x8xf32>
    %47 = arith.mulf %42, %46 : vector<8x8xf32>
    %cst_15 = arith.constant dense<0.000000e+00> : vector<8x8xf32>
    %48 = tpu.matmul %47, %34, %cst_15 {dimension_numbers = #tpu.dot_dimension_numbers<[1], [0], [0], [1], [0, 0, 1, 1], [], []>} : vector<8x8xf32>, vector<8x8xf32>, vector<8x8xf32> -> vector<8x8xf32>
    %49 = vector.extract_strided_slice %14 {offsets = [0, 16], sizes = [8, 8], strides = [1, 1]} : vector<8x96xf32> to vector<8x8xf32>
    %50 = vector.extract_strided_slice %14 {offsets = [0, 48], sizes = [8, 8], strides = [1, 1]} : vector<8x96xf32> to vector<8x8xf32>
    %51 = vector.extract_strided_slice %14 {offsets = [0, 80], sizes = [8, 8], strides = [1, 1]} : vector<8x96xf32> to vector<8x8xf32>
    "tpu.trace_start"() <{level = 10 : i32, message = "qd,kd->qk"}> : () -> ()
    %cst_16 = arith.constant dense<0.000000e+00> : vector<8x8xf32>
    %52 = tpu.matmul %49, %50, %cst_16 {dimension_numbers = #tpu.dot_dimension_numbers<[1], [1], [0], [0], [0, 0, 1, 0], [], []>} : vector<8x8xf32>, vector<8x8xf32>, vector<8x8xf32> -> vector<8x8xf32>
    "tpu.trace_stop"() : () -> ()
    %cst_17 = arith.constant 0.353553385 : f32
    %53 = vector.broadcast %cst_17 : f32 to vector<8x8xf32>
    %54 = arith.mulf %52, %53 : vector<8x8xf32>
    %cst_18 = arith.constant dense<0xFF800000> : vector<8xf32>
    %55 = vector.multi_reduction <maximumf>, %54, %cst_18 [1] : vector<8x8xf32> to vector<8xf32>
    %56 = vector.shape_cast %55 : vector<8xf32> to vector<8x1xf32>
    %57 = vector.broadcast %56 : vector<8x1xf32> to vector<8x8xf32>
    %58 = arith.subf %54, %57 : vector<8x8xf32>
    %59 = math.exp %58 : vector<8x8xf32>
    %cst_19 = arith.constant dense<0.000000e+00> : vector<8xf32>
    %60 = vector.multi_reduction <add>, %59, %cst_19 [1] : vector<8x8xf32> to vector<8xf32>
    %61 = vector.shape_cast %60 : vector<8xf32> to vector<8x1xf32>
    %62 = tpu.reciprocal %61 {approx = true} : vector<8x1xf32> -> vector<8x1xf32>
    %63 = vector.broadcast %62 : vector<8x1xf32> to vector<8x8xf32>
    %64 = arith.mulf %59, %63 : vector<8x8xf32>
    %cst_20 = arith.constant dense<0.000000e+00> : vector<8x8xf32>
    %65 = tpu.matmul %64, %51, %cst_20 {dimension_numbers = #tpu.dot_dimension_numbers<[1], [0], [0], [1], [0, 0, 1, 1], [], []>} : vector<8x8xf32>, vector<8x8xf32>, vector<8x8xf32> -> vector<8x8xf32>
    %66 = vector.extract_strided_slice %14 {offsets = [0, 24], sizes = [8, 8], strides = [1, 1]} : vector<8x96xf32> to vector<8x8xf32>
    %67 = vector.extract_strided_slice %14 {offsets = [0, 56], sizes = [8, 8], strides = [1, 1]} : vector<8x96xf32> to vector<8x8xf32>
    %68 = vector.extract_strided_slice %14 {offsets = [0, 88], sizes = [8, 8], strides = [1, 1]} : vector<8x96xf32> to vector<8x8xf32>
    "tpu.trace_start"() <{level = 10 : i32, message = "qd,kd->qk"}> : () -> ()
    %cst_21 = arith.constant dense<0.000000e+00> : vector<8x8xf32>
    %69 = tpu.matmul %66, %67, %cst_21 {dimension_numbers = #tpu.dot_dimension_numbers<[1], [1], [0], [0], [0, 0, 1, 0], [], []>} : vector<8x8xf32>, vector<8x8xf32>, vector<8x8xf32> -> vector<8x8xf32>
    "tpu.trace_stop"() : () -> ()
    %cst_22 = arith.constant 0.353553385 : f32
    %70 = vector.broadcast %cst_22 : f32 to vector<8x8xf32>
    %71 = arith.mulf %69, %70 : vector<8x8xf32>
    %cst_23 = arith.constant dense<0xFF800000> : vector<8xf32>
    %72 = vector.multi_reduction <maximumf>, %71, %cst_23 [1] : vector<8x8xf32> to vector<8xf32>
    %73 = vector.shape_cast %72 : vector<8xf32> to vector<8x1xf32>
    %74 = vector.broadcast %73 : vector<8x1xf32> to vector<8x8xf32>
    %75 = arith.subf %71, %74 : vector<8x8xf32>
    %76 = math.exp %75 : vector<8x8xf32>
    %cst_24 = arith.constant dense<0.000000e+00> : vector<8xf32>
    %77 = vector.multi_reduction <add>, %76, %cst_24 [1] : vector<8x8xf32> to vector<8xf32>
    %78 = vector.shape_cast %77 : vector<8xf32> to vector<8x1xf32>
    %79 = tpu.reciprocal %78 {approx = true} : vector<8x1xf32> -> vector<8x1xf32>
    %80 = vector.broadcast %79 : vector<8x1xf32> to vector<8x8xf32>
    %81 = arith.mulf %76, %80 : vector<8x8xf32>
    %cst_25 = arith.constant dense<0.000000e+00> : vector<8x8xf32>
    %82 = tpu.matmul %81, %68, %cst_25 {dimension_numbers = #tpu.dot_dimension_numbers<[1], [0], [0], [1], [0, 0, 1, 1], [], []>} : vector<8x8xf32>, vector<8x8xf32>, vector<8x8xf32> -> vector<8x8xf32>
    %83 = tpu.concatenate %31, %48, %65, %82 in 1 : vector<8x8xf32>, vector<8x8xf32>, vector<8x8xf32>, vector<8x8xf32> -> vector<8x32xf32>
    %c0_26 = arith.constant 0 : index
    %c0_27 = arith.constant 0 : index
    %84 = vector.load %arg3[%c0_26, %c0_27] : memref<32x32xf32, #tpu.memory_space<vmem>>, vector<32x32xf32>
    %cst_28 = arith.constant dense<0.000000e+00> : vector<8x32xf32>
    %85 = tpu.matmul %83, %84, %cst_28 {dimension_numbers = #tpu.dot_dimension_numbers<[1], [0], [0], [1], [0, 0, 1, 1], [], []>} : vector<8x32xf32>, vector<32x32xf32>, vector<8x32xf32> -> vector<8x32xf32>
    %86 = vector.broadcast %4 : vector<1x32xf32> to vector<8x32xf32>
    %87 = arith.addf %85, %86 : vector<8x32xf32>
    %88 = arith.addf %1, %87 : vector<8x32xf32>
    %cst_29 = arith.constant dense<0.000000e+00> : vector<8xf32>
    %89 = vector.multi_reduction <add>, %88, %cst_29 [1] : vector<8x32xf32> to vector<8xf32>
    %90 = vector.shape_cast %89 : vector<8xf32> to vector<8x1xf32>
    %cst_30 = arith.constant 3.200000e+01 : f32
    %91 = vector.broadcast %cst_30 : f32 to vector<8x1xf32>
    %92 = arith.divf %90, %91 : vector<8x1xf32>
    %93 = vector.broadcast %92 : vector<8x1xf32> to vector<8x32xf32>
    %94 = arith.subf %88, %93 : vector<8x32xf32>
    %95 = arith.mulf %94, %94 : vector<8x32xf32>
    %cst_31 = arith.constant dense<0.000000e+00> : vector<8xf32>
    %96 = vector.multi_reduction <add>, %95, %cst_31 [1] : vector<8x32xf32> to vector<8xf32>
    %97 = vector.shape_cast %96 : vector<8xf32> to vector<8x1xf32>
    %cst_32 = arith.constant 3.200000e+01 : f32
    %98 = vector.broadcast %cst_32 : f32 to vector<8x1xf32>
    %99 = arith.divf %97, %98 : vector<8x1xf32>
    %100 = vector.broadcast %92 : vector<8x1xf32> to vector<8x32xf32>
    %101 = arith.subf %88, %100 : vector<8x32xf32>
    %cst_33 = arith.constant 9.99999974E-6 : f32
    %102 = vector.broadcast %cst_33 : f32 to vector<8x1xf32>
    %103 = arith.addf %99, %102 : vector<8x1xf32>
    %104 = math.rsqrt %103 : vector<8x1xf32>
    %105 = vector.broadcast %104 : vector<8x1xf32> to vector<8x32xf32>
    %106 = arith.mulf %101, %105 : vector<8x32xf32>
    %107 = vector.broadcast %5 : vector<1x32xf32> to vector<8x32xf32>
    %108 = arith.mulf %106, %107 : vector<8x32xf32>
    %109 = vector.broadcast %6 : vector<1x32xf32> to vector<8x32xf32>
    %110 = arith.addf %108, %109 : vector<8x32xf32>
    %c0_34 = arith.constant 0 : index
    %c0_35 = arith.constant 0 : index
    %111 = vector.load %arg4[%c0_34, %c0_35] : memref<32x64xf32, #tpu.memory_space<vmem>>, vector<32x64xf32>
    %cst_36 = arith.constant dense<0.000000e+00> : vector<8x64xf32>
    %112 = tpu.matmul %110, %111, %cst_36 {dimension_numbers = #tpu.dot_dimension_numbers<[1], [0], [0], [1], [0, 0, 1, 1], [], []>} : vector<8x32xf32>, vector<32x64xf32>, vector<8x64xf32> -> vector<8x64xf32>
    %113 = vector.broadcast %7 : vector<1x64xf32> to vector<8x64xf32>
    %114 = arith.addf %112, %113 : vector<8x64xf32>
    %cst_37 = arith.constant 5.000000e-01 : f32
    %115 = vector.broadcast %cst_37 : f32 to vector<8x64xf32>
    %116 = arith.mulf %115, %114 : vector<8x64xf32>
    %cst_38 = arith.constant 4.471500e-02 : f32
    %117 = vector.broadcast %cst_38 : f32 to vector<8x64xf32>
    %118 = arith.mulf %117, %114 : vector<8x64xf32>
    %119 = arith.mulf %118, %114 : vector<8x64xf32>
    %120 = arith.mulf %119, %114 : vector<8x64xf32>
    %121 = arith.addf %114, %120 : vector<8x64xf32>
    %cst_39 = arith.constant 0.797884583 : f32
    %122 = vector.broadcast %cst_39 : f32 to vector<8x64xf32>
    %123 = arith.mulf %122, %121 : vector<8x64xf32>
    %124 = math.tanh %123 : vector<8x64xf32>
    %cst_40 = arith.constant 1.000000e+00 : f32
    %125 = vector.broadcast %cst_40 : f32 to vector<8x64xf32>
    %126 = arith.addf %125, %124 : vector<8x64xf32>
    %127 = arith.mulf %116, %126 : vector<8x64xf32>
    %c0_41 = arith.constant 0 : index
    %c0_42 = arith.constant 0 : index
    %128 = vector.load %arg5[%c0_41, %c0_42] : memref<64x32xf32, #tpu.memory_space<vmem>>, vector<64x32xf32>
    %cst_43 = arith.constant dense<0.000000e+00> : vector<8x32xf32>
    %129 = tpu.matmul %127, %128, %cst_43 {dimension_numbers = #tpu.dot_dimension_numbers<[1], [0], [0], [1], [0, 0, 1, 1], [], []>} : vector<8x64xf32>, vector<64x32xf32>, vector<8x32xf32> -> vector<8x32xf32>
    %130 = vector.broadcast %8 : vector<1x32xf32> to vector<8x32xf32>
    %131 = arith.addf %129, %130 : vector<8x32xf32>
    %132 = arith.addf %110, %131 : vector<8x32xf32>
    %cst_44 = arith.constant dense<0.000000e+00> : vector<8xf32>
    %133 = vector.multi_reduction <add>, %132, %cst_44 [1] : vector<8x32xf32> to vector<8xf32>
    %134 = vector.shape_cast %133 : vector<8xf32> to vector<8x1xf32>
    %cst_45 = arith.constant 3.200000e+01 : f32
    %135 = vector.broadcast %cst_45 : f32 to vector<8x1xf32>
    %136 = arith.divf %134, %135 : vector<8x1xf32>
    %137 = vector.broadcast %136 : vector<8x1xf32> to vector<8x32xf32>
    %138 = arith.subf %132, %137 : vector<8x32xf32>
    %139 = arith.mulf %138, %138 : vector<8x32xf32>
    %cst_46 = arith.constant dense<0.000000e+00> : vector<8xf32>
    %140 = vector.multi_reduction <add>, %139, %cst_46 [1] : vector<8x32xf32> to vector<8xf32>
    %141 = vector.shape_cast %140 : vector<8xf32> to vector<8x1xf32>
    %cst_47 = arith.constant 3.200000e+01 : f32
    %142 = vector.broadcast %cst_47 : f32 to vector<8x1xf32>
    %143 = arith.divf %141, %142 : vector<8x1xf32>
    %144 = vector.broadcast %136 : vector<8x1xf32> to vector<8x32xf32>
    %145 = arith.subf %132, %144 : vector<8x32xf32>
    %cst_48 = arith.constant 9.99999974E-6 : f32
    %146 = vector.broadcast %cst_48 : f32 to vector<8x1xf32>
    %147 = arith.addf %143, %146 : vector<8x1xf32>
    %148 = math.rsqrt %147 : vector<8x1xf32>
    %149 = vector.broadcast %148 : vector<8x1xf32> to vector<8x32xf32>
    %150 = arith.mulf %145, %149 : vector<8x32xf32>
    %151 = vector.broadcast %9 : vector<1x32xf32> to vector<8x32xf32>
    %152 = arith.mulf %150, %151 : vector<8x32xf32>
    %153 = vector.broadcast %10 : vector<1x32xf32> to vector<8x32xf32>
    %154 = arith.addf %152, %153 : vector<8x32xf32>
    %c0_49 = arith.constant 0 : index
    %c0_50 = arith.constant 0 : index
    %c0_51 = arith.constant 0 : index
    %155 = vector.load %arg7[%c0_49, %c0_50, %c0_51] : memref<1x8x32xf32, #tpu.memory_space<vmem>>, vector<1x8x32xf32>
    %156 = vector.shape_cast %155 : vector<1x8x32xf32> to vector<8x32xf32>
    %157 = vector.shape_cast %154 : vector<8x32xf32> to vector<1x8x32xf32>
    tpu.vector_store %arg7[%c0_49, %c0_50, %c0_51], %157 {strides = array<i32>} : memref<1x8x32xf32, #tpu.memory_space<vmem>>, vector<1x8x32xf32>,
    return
  }
  func.func @transform_0(%arg0: i32) -> (i32, i32, i32) {
    %c0_i32 = arith.constant 0 : i32
    %c0_i32_0 = arith.constant 0 : i32
    %c0_i32_1 = arith.constant 0 : i32
    return %arg0, %c0_i32, %c0_i32_0 : i32, i32, i32
  }
  func.func @transform_1(%arg0: i32) -> (i32, i32) {
    %c0_i32 = arith.constant 0 : i32
    %c0_i32_0 = arith.constant 0 : i32
    %c0_i32_1 = arith.constant 0 : i32
    return %c0_i32, %c0_i32_0 : i32, i32
  }
  func.func @transform_2(%arg0: i32) -> (i32, i32) {
    %c0_i32 = arith.constant 0 : i32
    %c0_i32_0 = arith.constant 0 : i32
    %c0_i32_1 = arith.constant 0 : i32
    return %c0_i32, %c0_i32_0 : i32, i32
  }
  func.func @transform_3(%arg0: i32) -> (i32, i32) {
    %c0_i32 = arith.constant 0 : i32
    %c0_i32_0 = arith.constant 0 : i32
    %c0_i32_1 = arith.constant 0 : i32
    return %c0_i32, %c0_i32_0 : i32, i32
  }
  func.func @transform_4(%arg0: i32) -> (i32, i32) {
    %c0_i32 = arith.constant 0 : i32
    %c0_i32_0 = arith.constant 0 : i32
    %c0_i32_1 = arith.constant 0 : i32
    return %c0_i32, %c0_i32_0 : i32, i32
  }
  func.func @transform_5(%arg0: i32) -> (i32, i32) {
    %c0_i32 = arith.constant 0 : i32
    %c0_i32_0 = arith.constant 0 : i32
    %c0_i32_1 = arith.constant 0 : i32
    return %c0_i32, %c0_i32_0 : i32, i32
  }
  func.func @transform_6(%arg0: i32) -> (i32, i32, i32) {
    %c0_i32 = arith.constant 0 : i32
    %c0_i32_0 = arith.constant 0 : i32
    %c0_i32_1 = arith.constant 0 : i32
    return %arg0, %c0_i32, %c0_i32_0 : i32, i32, i32
  }
}

</mosaic_0001>

<bundles_post_ra>
// kernel: tpu_custom_call.1
= control target key start
LH: loop header
LB: loop body
LE: loop exit
PB: predicated region body
PF: predicated region fallthrough
CT: control target
= control target key end

     0   :  { %11 = vsyncpa [#allocation3], 0  ;;  %s2187_s0 = inlined_call_operand.hbm [shape: f32[2,8,32], index: 0, kind: input, shape index: {}]   ;;  %s2188_s1 = inlined_call_operand.vmem [shape: f32[32,96], index: 1, kind: input, shape index: {}]   ;;  %s2189_s2 = inlined_call_operand.vmem [shape: f32[32,32], index: 2, kind: input, shape index: {}]   ;;  %s2190_s3 = inlined_call_operand.vmem [shape: f32[32,64], index: 3, kind: input, shape index: {}]   ;;  %s2191_s4 = inlined_call_operand.vmem [shape: f32[64,32], index: 4, kind: input, shape index: {}]   ;;  %s2192_s5 = inlined_call_operand.vmem [shape: f32[8,128], index: 5, kind: input, shape index: {}]   ;;  %s2193_s6 = inlined_call_operand.hbm [shape: f32[2,8,32], index: 6, kind: output, shape index: {}]  }
   0x1   :  { %13 = vsyncpa [#allocation3 + $0x1], 0 }
   0x2   :  { %14 = vsyncpa [#allocation4], 0 }
   0x3   :  { %16 = vsyncpa [#allocation4 + $0x1], 0  ;;  %s1850_s21 = smov 0   ;;  %s1852_s22 = smov 0  }
   0x4   :  { %s1854_s23 = smov 0   ;;  %s1856_s24 = smov 0  }
   0x5 LB: > { %s1871_s25 = sadd.s32 4294967295, %s1794_s24   ;;  %s1423_s26 = sadd.s32 4294967294, %s1794_s24   ;;  %s1794_s24 = sphi %s1856_s24, %s2208_s24   ;;  %s1790_s23 = sphi %s1854_s23, %s2207_s23   ;;  %s1786_s22 = sphi %s1852_s22, %s2206_s22   ;;  %s1782_s21 = sphi %s1850_s21, %s2205_s21  }
   0x6   : > { %s1875_s27 = sadd.s32 1, %s1794_s24   ;;  %s29_s28 = sadd.s32 1, %s1790_s23 }
   0x7   : > { %s26_s29 = ssub.s32 %s1794_s24, %s1875_s27  ;;  %p36_p0 = scmp.ne.s32.totalorder %s1790_s23, %s1786_s22 }
   0x8   : > { %p27_p1 = scmp.eq.s32.totalorder %s26_s29, 0  ;;  %p37_p2 = scmp.eq.s32.totalorder %s1794_s24, 0 }
   0x9   : > { %p42_p3 = scmp.ne.s32.totalorder %s1786_s22, %s1782_s21  ;;  %p43_p4 = scmp.eq.s32.totalorder %s1871_s25, 0 }
   0xa   : > { %s1887_s30 = scalar_select %p27_p1, %s1790_s23, %s29_s28  }
   0xb   : > { %p1889_p5 = por %p37_p2, %p36_p0  ;;  %p1893_p6 = por %p43_p4, %p42_p3 }
   0xc   : > { %p171_p7 = scmp.eq.s32.totalorder %s1871_s25, 1  ;;  %p177_p8 = scmp.eq.s32.totalorder %s1423_s26, 1 }
   0xd   : > { %p1625_p10 = scmp.lt.s32.totalorder %s1794_s24, 2  ;;  %s212_s11 = sand.u32 1, %s1790_s23  }
   0xe   : > { %p1900_p11 = por %p171_p7, %p36_p0  ;;  %p1904_p12 = por %p177_p8, %p42_p3 }
   0xf   : > { %s1427_s12 = sshll.u32 %s1794_s24, 7  ;;  %s1426_s13 = sshll.u32 %s212_s11, 3 }
  0x10   : > { %s2197_s9 = scalar_select %p1900_p11, 1, 0 }
  0x11   : > { %s2198_s10 = scalar_select %p1904_p12, 1, 0 }
  0x12   : > { %s1913_s16 = scalar_lea.hbm %s2187_s0, %s1427_s12  ;;  %s216_s17 = scalar_lea.vmem [#allocation2], %s1426_s13 }
  0x13   : > { %s223_s18 = sshll.u32 %s216_s17, 4  ;;  %p1917_p13 = pnand %p1625_p10, %p1889_p5  ;;  %s1921_s18 = int_to_ptr.vmem [resolvable:$true] %s223_s18 }
  0x14   : > { %s213_s20 = scalar_lea.sflag [#allocation3], %s212_s11  ;;  %s1698_s26 = scalar_lea.hbm %s1913_s16, 128 }
  0x15   : > { %p1699_p2 = scmp.ne.s32.totalorder %s1913_s16, %s1698_s26  ;;  %p1700_p3 = pneg %p1917_p13 }
  0x16   : > { %s1703_s7 = scalar_lea.hbm %s2187_s0, 256  ;;  %p1704_p5 = scmp.lt.u32.totalorder %s1913_s16, %s2187_s0 }
  0x17   : > { %p1701_p4 = pnand %p1700_p3, %p1699_p2  ;;  %p1705_p8 = scmp.lt.u32.totalorder %s1703_s7, %s1698_s26 }
  0x18   : > { %p1707_p9 = scmp.lt.u32.totalorder %s1698_s26, %s1913_s16 }
  0x19   : > { %p1702_p7 = pneg %p1701_p4  ;;  %p1706_p10 = por %p1705_p8, %p1704_p5 }
  0x1b   : > { %p1708_p0 = por %p1707_p9, %p1706_p10 }
  0x1d   : > { %p1709_p1 = pnand %p1708_p0, %p1702_p7 }
  0x1f   : > { %1712 = shalt.err (!%p1709_p1)
}
  0x20   : > { %s1713_s11 = scalar_lea.vmem %s1921_s18, 128  ;;  %s1796_s14 = smov [#allocation2]  }
  0x21   : > { %p1714_p2 = scmp.ne.s32.totalorder %s1921_s18, %s1713_s11  ;;  %s1718_s15 = sshll.u32 %s1796_s14, 4  ;;  %s1719_s15 = int_to_ptr.vmem [resolvable:$false] %s1718_s15 }
  0x22   : > { %s1720_s17 = scalar_lea.vmem %s1719_s15, 256  ;;  %p1721_p11 = scmp.lt.s32.totalorder %s1921_s18, %s1719_s15 }
  0x23   : > { %p1716_p4 = pnand %p1714_p2, %p1700_p3  ;;  %p1722_p5 = scmp.lt.s32.totalorder %s1720_s17, %s1713_s11 }
  0x25   : > { %p1717_p12 = pneg %p1716_p4  ;;  %p1723_p8 = por %p1722_p5, %p1721_p11 }
  0x27   : > { %p1724_p9 = pnand %p1723_p8, %p1717_p12 }
  0x29   : > { %1727 = shalt.err (!%p1724_p9)
}
  0x2a   : > { %1620 = dma.hbm_to_vmem [thread:$0]  (!%p1917_p13), %s1913_s16, 128, %s1921_s18, %s213_s20  }
  0x2b   : > { %p2200_p0 = scmp.lt.s32.totalorder %s1794_s24, 3  ;;  %p2201_p1 = scmp.ge.s32.totalorder %s1794_s24, 1 }
  0x2d   : > { %p229_p3 = pnand %p2201_p1, %p2200_p0 }
  0x2e   : > { %s1955_s26 = sand.u32 (!%p229_p3), 1, %s1786_s22  }
  0x2f   : > { %232 = sbr.rel (%p229_p3) target bundleno = 2621 (0xa3d), region = 44  ;;  %s1429_s28 = sshll.u32 (!%p229_p3), %s1955_s26, 3 }
  0x30   : > { %s235_s29 = scalar_lea.sflag (!%p229_p3), [#allocation3], %s1955_s26  ;;  %s238_s19 = scalar_lea.vmem (!%p229_p3), [#allocation2], %s1429_s28 }
  0x36   : > { %1773 = dma.done.wait (%p1893_p6), %s235_s29, 128  }
  0x37   : > { %1775 = vsyncadd (%p1893_p6), %s235_s29, 4294967168  ;;  %v1797_v0 = vmov 0.0|0.0   ;;  %vm1798_vm0 = vmmov 0   ;;  %v1799_v1 = vmov 0.0   ;;  %v269_v2 = vld [vmem:[%s2188_s1] sm:$0xff]  ;;  %v270_v3 = vld [vmem:[%s2188_s1 + $0x8] sm:$0xff]  ;;  %v273_v9 = vlaneseq }
  0x38   : > { %1583 = vmatprep.subr.bf16.mxu1 %v1797_v0  ;;  %1499 = vmatprep.mubr.msk.f32.mxu1 %vm1798_vm0, %v1799_v1  ;;  %v271_v4 = vld [vmem:[%s2188_s1 + $0x10] sm:$0xff]  ;;  %v1584_v5 = vpack.c.bf16 %v270_v3, %v269_v2  ;;  %v272_v6 = vld [vmem:[%s2188_s1 + $0x18] sm:$0xff]  ;;  %v1984_v8 = vld [vmem:[%s238_s19] sm:$0xff]  ;;  %vm277_vm1 = vcmask 261120   ;;  %s1800_s17 = smov 120   ;;  %s1801_s29 = smov 96  }
  0x39   : > { %1512 = vmatprep.subr.mxu0 %v1799_v1  ;;  %1514 = vmatprep.mubr.msk.f32.mxu0 %vm1798_vm0, %v1799_v1  ;;  %v1587_v7 = vpack.c.bf16 %v272_v6, %v271_v4  ;;  %v1991_v10 = vshrl.u32 %v273_v9, 7  ;;  %v1997_v12 = vld [vmem:[%s2192_s5] sm:$0xff]  ;;  %s1802_s19 = smov 80   ;;  %s1803_s16 = smov 88   ;;  %vm354_vm2 = vcmask 64512   ;;  %vm1028_vm3 = vcmask 130048  }
  0x3a   : > { %1585 = vmatpush3.bf16.msra.mxu1 %v1584_v5  ;;  %s1804_s18 = smov 72   ;;  %s1805_s20 = smov 112   ;;  %vm1030_vm4 = vcmask 195584   ;;  %vm1240_vm5 = vcmask 523264  }
  0x3b   : > { %1586 = vmatprep.subr.bf16.mxu1 %v1797_v0  ;;  %v275_v11 = vsub.s32 0, %v1991_v10  ;;  %s1806_s8 = smov 104   ;;  %s1807_s7 = smov 56  }
  0x3c   : > { %s1808_s12 = smov 64   ;;  %s1809_s13 = smov 48  }
  0x3d   : > { %v276_v13 = vrot.slane %v1997_v12, %v275_v11  ;;  %s1810_s11 = smov 40   ;;  %p2202_p11 = scmp.ne.s32.totalorder %s2197_s9, 0 }
  0x3e   : > { %1588 = vmatpush3.bf16.msra.mxu1 %v1587_v7 }
  0x3f   : > { %1502 = vmatprep.subr.mxu1 %v1799_v1 }
  0x41   : > { %1500 = vmatmul.mubr.msk.f32.vlgmr.msra.gmra.mrb[0].mxu1 %vm277_vm1, %v1984_v8 }
  0x42   : > { %1504 = vmatprep.mubr.msk.f32.mxu1 %vm1798_vm0, %v1799_v1 }
 0x114   : > { %v347_v14 = vpop.f32.mrb[0].mxu1 }
 0x115   : > { %v2000_v15 = vadd.f32 %v347_v14, %v276_v13  ;;  %v1501_v16 = vpop.f32.mrb[1].mxu1 }
 0x117   : > { %517 = vrot.lane.b32.xlu1 %v2000_v15, %s1800_s17  ;;  %352 = vrot.lane.b32.xlu0 %v2000_v15, %s1801_s29  ;;  %s1340_s17 = scalar_lea.sflag [#allocation4], %s1955_s26 }
 0x11b   : > { %685 = vrot.lane.b32.xlu1 %v2000_v15, %s1802_s19  ;;  %519 = vrot.lane.b32.xlu0 %v2000_v15, %s1803_s16  ;;  %s1811_s19 = smov 8  }
 0x11f   : > { %851 = vrot.lane.b32.xlu1 %v2000_v15, %s1804_s18  ;;  %683 = vrot.lane.b32.xlu0 %v2000_v15, %s1805_s20 }
 0x123   : > { %849 = vrot.lane.b32.xlu0 %v2000_v15, %s1806_s8 }
 0x189   : > { %v518_v17 = vpop.permute.xlu1 %517  ;;  %v353_v18 = vpop.permute.xlu0 %352 }
 0x18a   : > { %1503 = vmatpush3.xpose.msk.msra.mxu1 %vm354_vm2, %v353_v18  ;;  %v1033_v18 = vld [vmem:[%s2189_s2 + $0x8] sm:$0xff] }
 0x18b   : > { %1507 = vmatprep.subr.mxu1 %v1799_v1 }
 0x18d   : > { %1505 = vmatmul.mubr.msk.f32.vlgmr.msra.gmra.mrb[2].mxu1 %vm354_vm2, %v2000_v15  ;;  %v520_v19 = vpop.permute.xlu0 %519  ;;  %v686_v20 = vpop.permute.xlu1 %685 }
 0x18e   : > { %1513 = vmatpush3.xpose.msk.msra.mxu0 %vm354_vm2, %v520_v19  ;;  %1509 = vmatprep.mubr.msk.f32.mxu1 %vm1798_vm0, %v1799_v1 }
 0x18f   : > { %1522 = vmatprep.subr.mxu0 %v1799_v1 }
 0x191   : > { %1515 = vmatmul.mubr.msk.f32.vlgmr.msra.gmra.mrb[0].mxu0 %vm354_vm2, %v518_v17  ;;  %v684_v21 = vpop.permute.xlu0 %683  ;;  %v852_v22 = vpop.permute.xlu1 %851  ;;  %v1032_v17 = vld [vmem:[%s2189_s2] sm:$0xff] }
 0x192   : > { %1523 = vmatpush3.xpose.msk.msra.mxu0 %vm354_vm2, %v686_v20  ;;  %1524 = vmatprep.mubr.msk.f32.mxu0 %vm1798_vm0, %v1799_v1  ;;  %v1590_v19 = vpack.c.bf16 %v1033_v18, %v1032_v17  ;;  %v1144_v17 = vsub.s32 4, %v1991_v10 }
 0x193   : > { %1532 = vmatprep.subr.mxu0 %v1799_v1 }
 0x194   : > { %v1145_v18 = vrot.slane %v1997_v12, %v1144_v17 }
 0x195   : > { %1525 = vmatmul.mubr.msk.f32.vlgmr.msra.gmra.mrb[2].mxu0 %vm354_vm2, %v684_v21  ;;  %v850_v23 = vpop.permute.xlu0 %849 }
 0x196   : > { %1533 = vmatpush3.xpose.msk.msra.mxu0 %vm354_vm2, %v852_v22  ;;  %1534 = vmatprep.mubr.msk.f32.mxu0 %vm1798_vm0, %v1799_v1 }
 0x197   : > { %1589 = vmatprep.subr.bf16.mxu0 %v1797_v0 }
 0x199   : > { %1535 = vmatmul.mubr.msk.f32.vlgmr.msra.gmra.mrb[4].mxu0 %vm354_vm2, %v850_v23 }
 0x19a   : > { %1550 = vmatprep.mubr.msk.f32.mxu0 %vm1798_vm0, %v1799_v1  ;;  %1591 = vmatpush3.bf16.msra.mxu0 %v1590_v19 }
 0x19b   : > { %1592 = vmatprep.subr.bf16.mxu0 %v1797_v0 }
 0x260   : > { %v425_v24 = vpop.f32.mrb[2].mxu1 }
 0x261   : > { %v429_v25 = vmul.f32 0.35355338, %v425_v24  ;;  %v1506_v26 = vpop.f32.mrb[3].mxu1  ;;  %v1034_v24 = vld [vmem:[%s2189_s2 + $0x10] sm:$0xff] }
 0x263   : > { %v430_v27 = vsel %vm354_vm2, %v429_v25, -inf }
 0x264   : > { %v591_v28 = vpop.f32.mrb[0].mxu0  ;;  %431 = vmax.xlane.f32.xlu1 %v430_v27 }
 0x265   : > { %v595_v29 = vmul.f32 0.35355338, %v591_v28  ;;  %v1516_v30 = vpop.f32.mrb[1].mxu0 }
 0x267   : > { %v596_v31 = vsel %vm354_vm2, %v595_v29, -inf }
 0x268   : > { %597 = vmax.xlane.f32.xlu0 %v596_v31  ;;  %v757_v32 = vpop.f32.mrb[2].mxu0 }
 0x269   : > { %v761_v33 = vmul.f32 0.35355338, %v757_v32  ;;  %v1526_v34 = vpop.f32.mrb[3].mxu0 }
 0x26b   : > { %v762_v35 = vsel %vm354_vm2, %v761_v33, -inf }
 0x26c   : > { %763 = vmax.xlane.f32.xlu0 %v762_v35  ;;  %v923_v36 = vpop.f32.mrb[4].mxu0 }
 0x26d   : > { %v927_v37 = vmul.f32 0.35355338, %v923_v36  ;;  %v1536_v38 = vpop.f32.mrb[5].mxu0 }
 0x26f   : > { %v928_v39 = vsel %vm354_vm2, %v927_v37, -inf }
 0x270   : > { %929 = vmax.xlane.f32.xlu1 %v928_v39 }
 0x281   : > { %607 = vrot.lane.b32.xlu1 %v2000_v15, %s1807_s7  ;;  %s1812_s7 = smov 16  }
 0x2f1   : > { %v432_v40 = vpop.xlane.xlu1 %431 }
 0x2f2   : > { %v433_v41 = vsub.f32 %v429_v25, %v432_v40  ;;  %v1035_v25 = vld [vmem:[%s2189_s2 + $0x18] sm:$0xff] }
 0x2f3   : > { %v1593_v26 = vpack.c.bf16 %v1035_v25, %v1034_v24 }
 0x2f4   : > { %v434_v42 = vmul.f32 1.442695, %v433_v41 }
 0x2f5   : > { %v598_v43 = vpop.xlane.xlu0 %597  ;;  %1594 = vmatpush3.bf16.msra.mxu0 %v1593_v26 }
 0x2f6   : > { %1676 = vpow2.f32 %v434_v42  ;;  %v599_v44 = vsub.f32 %v595_v29, %v598_v43  ;;  %1601 = vmatprep.subr.bf16.mxu0 %v1797_v0 }
 0x2f8   : > { %v600_v45 = vmul.f32 1.442695, %v599_v44 }
 0x2f9   : > { %v764_v55 = vpop.xlane.xlu0 %763 }
 0x2fa   : > { %1678 = vpow2.f32 %v600_v45  ;;  %v765_v56 = vsub.f32 %v761_v33, %v764_v55 }
 0x2fc   : > { %v766_v57 = vmul.f32 1.442695, %v765_v56  ;;  %v1130_v56 = vsub.s32 2, %v1991_v10 }
 0x2fd   : > { %v930_v46 = vpop.xlane.xlu1 %929 }
 0x2fe   : > { %v931_v47 = vsub.f32 %v927_v37, %v930_v46  ;;  %v1038_v37 = vsub.s32 1, %v1991_v10 }
 0x300   : > { %v1677_v48 = vpop.eup %1676  ;;  %v932_v49 = vmul.f32 1.442695, %v931_v47  ;;  %v1039_v38 = vrot.slane %v1997_v12, %v1038_v37 }
 0x301   : > { %v436_v50 = vsel %vm354_vm2, %v1677_v48, 0.0  ;;  %v608_v60 = vpop.permute.xlu1 %607 }
 0x302   : > { %1680 = vpow2.f32 %v932_v49  ;;  %437 = vadd.xlane.f32.xlu0 %v436_v50  ;;  %v1139_v49 = vld [vmem:[%s2190_s3 + $0x8] sm:$0xff] }
 0x303   : > { %1682 = vpow2.f32 %v766_v57  ;;  %v1135_v57 = vsub.s32 3, %v1991_v10 }
 0x304   : > { %v1679_v51 = vpop.eup %1678 }
 0x305   : > { %v602_v52 = vsel %vm354_vm2, %v1679_v51, 0.0 }
 0x306   : > { %603 = vadd.xlane.f32.xlu1 %v602_v52 }
 0x30c   : > { %v1681_v53 = vpop.eup %1680 }
 0x30d   : > { %v934_v54 = vsel %vm354_vm2, %v1681_v53, 0.0  ;;  %v1683_v58 = vpop.eup %1682 }
 0x30e   : > { %935 = vadd.xlane.f32.xlu1 %v934_v54  ;;  %v768_v59 = vsel %vm354_vm2, %v1683_v58, 0.0 }
 0x318   : > { %441 = vrot.lane.b32.xlu0 %v2000_v15, %s1808_s12  ;;  %s1813_s12 = smov 24  }
 0x31f   : > { %773 = vrot.lane.b32.xlu1 %v2000_v15, %s1809_s13 }
 0x337   : > { %769 = vadd.xlane.f32.xlu0 %v768_v59 }
 0x34d   : > { %939 = vrot.lane.b32.xlu0 %v2000_v15, %s1810_s11 }
 0x38f   : > { %v438_v61 = vpop.xlane.xlu0 %437 }
 0x390   : > { %1684 = vrcp.f32 %v438_v61  ;;  %v1136_v61 = vrot.slane %v1997_v12, %v1135_v57 }
 0x393   : > { %v442_v62 = vpop.permute.xlu0 %441  ;;  %v604_v63 = vpop.xlane.xlu1 %603 }
 0x394   : > { %1686 = vrcp.f32 %v604_v63  ;;  %1508 = vmatpush3.msra.mxu1 %v442_v62 }
 0x395   : > { %1517 = vmatprep.subr.mxu1 %v1799_v1 }
 0x39a   : > { %v1685_v2 = vpop.eup %1684 }
 0x39b   : > { %v440_v3 = vmul.f32 %v1685_v2, %v1677_v48  ;;  %v936_v4 = vpop.xlane.xlu1 %935  ;;  %v1228_v2 = vld [vmem:[%s2191_s4] sm:$0xff] }
 0x39d   : > { %1510 = vmatmul.mubr.msk.f32.vlgmr.msra.gmra.mrb[4].mxu1 %vm354_vm2, %v440_v3  ;;  %v1229_v3 = vld [vmem:[%s2191_s4 + $0x8] sm:$0xff] }
 0x39e   : > { %v1687_v5 = vpop.eup %1686  ;;  %1518 = vmatpush3.msra.mxu1 %v608_v60  ;;  %1519 = vmatprep.mubr.msk.f32.mxu1 %vm1798_vm0, %v1799_v1 }
 0x39f   : > { %v606_v6 = vmul.f32 %v1687_v5, %v1679_v51  ;;  %v774_v7 = vpop.permute.xlu1 %773  ;;  %1527 = vmatprep.subr.mxu1 %v1799_v1  ;;  %v1141_v51 = vld [vmem:[%s2190_s3 + $0x18] sm:$0xff]  ;;  %v1230_v5 = vld [vmem:[%s2191_s4 + $0x10] sm:$0xff] }
 0x3a1   : > { %1520 = vmatmul.mubr.msk.f32.vlgmr.msra.gmra.mrb[6].mxu1 %vm354_vm2, %v606_v6  ;;  %v1231_v6 = vld [vmem:[%s2191_s4 + $0x18] sm:$0xff] }
 0x3a2   : > { %1528 = vmatpush3.msra.mxu1 %v774_v7  ;;  %1529 = vmatprep.mubr.msk.f32.mxu1 %vm1798_vm0, %v1799_v1  ;;  %v1605_v7 = vpack.c.bf16 %v1231_v6, %v1230_v5 }
 0x3a3   : > { %1537 = vmatprep.subr.mxu1 %v1799_v1 }
 0x3c4   : > { %v770_v9 = vpop.xlane.xlu0 %769 }
 0x3c5   : > { %1688 = vrcp.f32 %v770_v9  ;;  %v1232_v9 = vld [vmem:[%s2191_s4 + $0x20] sm:$0xff] }
 0x3c6   : > { %1690 = vrcp.f32 %v936_v4  ;;  %v1602_v4 = vpack.c.bf16 %v1229_v3, %v1228_v2 }
 0x3c8   : > { %v940_v15 = vpop.permute.xlu0 %939 }
 0x3cf   : > { %v1689_v11 = vpop.eup %1688 }
 0x3d0   : > { %v772_v13 = vmul.f32 %v1689_v11, %v1683_v58  ;;  %v1691_v14 = vpop.eup %1690  ;;  %v1131_v58 = vrot.slane %v1997_v12, %v1130_v56  ;;  %v1233_v11 = vld [vmem:[%s2191_s4 + $0x28] sm:$0xff] }
 0x3d1   : > { %v938_v16 = vmul.f32 %v1691_v14, %v1681_v53  ;;  %v1234_v14 = vld [vmem:[%s2191_s4 + $0x30] sm:$0xff] }
 0x3d2   : > { %1530 = vmatmul.mubr.msk.f32.vlgmr.msra.gmra.mrb[8].mxu1 %vm354_vm2, %v772_v13  ;;  %v1608_v13 = vpack.c.bf16 %v1233_v11, %v1232_v9 }
 0x3d3   : > { %1538 = vmatpush3.msra.mxu1 %v940_v15  ;;  %1539 = vmatprep.mubr.msk.f32.mxu1 %vm1798_vm0, %v1799_v1  ;;  %v1235_v15 = vld [vmem:[%s2191_s4 + $0x38] sm:$0xff] }
 0x3d4   : > { %1595 = vmatprep.subr.bf16.mxu1 %v1797_v0 }
 0x3d6   : > { %1540 = vmatmul.mubr.msk.f32.vlgmr.msra.gmra.mrb[10].mxu1 %vm354_vm2, %v938_v16  ;;  %v1611_v16 = vpack.c.bf16 %v1235_v15, %v1234_v14 }
 0x3d7   : > { %1561 = vmatprep.mubr.msk.f32.mxu1 %vm1798_vm0, %v1799_v1 }
 0x470   : > { %v513_v20 = vpop.f32.mrb[4].mxu1 }
 0x471   : > { %v1511_v21 = vpop.f32.mrb[5].mxu1 }
 0x474   : > { %v679_v22 = vpop.f32.mrb[6].mxu1 }
 0x475   : > { %1016 = vrot.lane.b32.xlu1 %v679_v22, %s1811_s19  ;;  %v1521_v23 = vpop.f32.mrb[7].mxu1 }
 0x4a5   : > { %v845_v27 = vpop.f32.mrb[8].mxu1 }
 0x4a6   : > { %1020 = vrot.lane.b32.xlu0 %v845_v27, %s1812_s7  ;;  %v1531_v28 = vpop.f32.mrb[9].mxu1  ;;  %s1448_s7 = sshll.u32 %s1871_s25, 7  ;;  %s1814_s25 = smov [#allocation5]  }
 0x4a7   : > { %s2142_s15 = scalar_lea.hbm %s2193_s6, %s1448_s7 }
 0x4a9   : > { %v1011_v29 = vpop.f32.mrb[10].mxu1 }
 0x4aa   : > { %1024 = vrot.lane.b32.xlu1 %v1011_v29, %s1813_s12  ;;  %v1541_v30 = vpop.f32.mrb[11].mxu1  ;;  %s266_s12 = scalar_lea.vmem [#allocation5], %s1429_s28  ;;  %s1732_s28 = sshll.u32 %s1814_s25, 4  ;;  %s1733_s28 = int_to_ptr.vmem [resolvable:$false] %s1732_s28 }
 0x4ab   : > { %s1353_s13 = sshll.u32 %s266_s12, 4  ;;  %s1734_s19 = scalar_lea.vmem %s1733_s28, 256  ;;  %s2144_s13 = int_to_ptr.vmem [resolvable:$true] %s1353_s13 }
 0x4ac   : > { %s1728_s29 = scalar_lea.vmem %s2144_s13, 128  ;;  %p1735_p7 = scmp.lt.s32.totalorder %s2144_s13, %s1733_s28 }
 0x4ad   : > { %p1729_p6 = scmp.ne.s32.totalorder %s2144_s13, %s1728_s29  ;;  %p1736_p10 = scmp.lt.s32.totalorder %s1734_s19, %s1728_s29 }
 0x4af   : > { %p1730_p12 = pnand %p1729_p6, %p2202_p11  ;;  %p1737_p2 = por %p1736_p10, %p1735_p7 }
 0x4b1   : > { %p1731_p13 = pneg %p1730_p12 }
 0x4b3   : > { %p1738_p4 = pnand %p1737_p2, %p1731_p13 }
 0x4e7   : > { %v1017_v31 = vpop.permute.xlu1 %1016 }
 0x4e8   : > { %v1027_v33 = vsel %vm354_vm2, %v513_v20, %v1017_v31 }
 0x518   : > { %v1021_v32 = vpop.permute.xlu0 %1020 }
 0x519   : > { %v1029_v34 = vsel %vm1028_vm3, %v1027_v33, %v1021_v32 }
 0x51c   : > { %v1025_v35 = vpop.permute.xlu1 %1024 }
 0x51d   : > { %v1031_v36 = vsel %vm1030_vm4, %v1029_v34, %v1025_v35 }
 0x51e   : > { %1551 = vmatmul.mubr.msk.f32.vlgmr.msra.gmra.mrb[6].mxu0 %vm277_vm1, %v1031_v36 }
 0x51f   : > { %1580 = vmatprep.mubr.msk.f32.mxu0 %vm1798_vm0, %v1799_v1  ;;  %v1138_v1 = vld [vmem:[%s2190_s3] sm:$0xff]  ;;  %1603 = vmatpush3.bf16.msra.mxu0 %v1602_v4 }
 0x520   : > { %v1596_v50 = vpack.c.bf16 %v1139_v49, %v1138_v1  ;;  %1604 = vmatprep.subr.bf16.mxu0 %v1797_v0 }
 0x522   : > { %1597 = vmatpush3.bf16.msra.mxu1 %v1596_v50 }
 0x523   : > { %1598 = vmatprep.subr.bf16.mxu1 %v1797_v0  ;;  %1606 = vmatpush3.bf16.msra.mxu0 %v1605_v7 }
 0x524   : > { %1607 = vmatprep.subr.bf16.mxu0 %v1797_v0 }
 0x527   : > { %1609 = vmatpush3.bf16.msra.mxu0 %v1608_v13 }
 0x528   : > { %1610 = vmatprep.subr.bf16.mxu0 %v1797_v0  ;;  %v1238_v0 = vsub.s32 5, %v1991_v10 }
 0x52a   : > { %v1239_v31 = vrot.slane %v1997_v12, %v1238_v0 }
 0x52b   : > { %1612 = vmatpush3.bf16.msra.mxu0 %v1611_v16 }
 0x5f1   : > { %v1109_v39 = vpop.f32.mrb[6].mxu0 }
 0x5f2   : > { %v1110_v40 = vadd.f32 %v1109_v39, %v1039_v38  ;;  %v1552_v41 = vpop.f32.mrb[7].mxu0 }
 0x5f4   : > { %v1113_v42 = vadd.f32 %v1110_v40, %v1984_v8  ;;  %v1140_v8 = vld [vmem:[%s2190_s3 + $0x10] sm:$0xff] }
 0x5f5   : > { %v1599_v52 = vpack.c.bf16 %v1141_v51, %v1140_v8 }
 0x5f6   : > { %v1114_v43 = vsel %vm277_vm1, %v1113_v42, 0.0 }
 0x5f7   : > { %1115 = vadd.xlane.f32.xlu0 %v1114_v43  ;;  %1600 = vmatpush3.bf16.msra.mxu1 %v1599_v52 }
 0x684   : > { %v1116_v44 = vpop.xlane.xlu0 %1115 }
 0x685   : > { %v1118_v45 = vmul.f32 0.03125, %v1116_v44 }
 0x687   : > { %v1119_v46 = vsub.f32 %v1113_v42, %v1118_v45  ;;  %v1330_v45 = vsub.s32 6, %v1991_v10 }
 0x689   : > { %v1120_v47 = vmul.f32 %v1119_v46, %v1119_v46 }
 0x68b   : > { %v1121_v48 = vsel %vm277_vm1, %v1120_v47, 0.0  ;;  %v1331_v47 = vrot.slane %v1997_v12, %v1330_v45 }
 0x68c   : > { %1122 = vadd.xlane.f32.xlu1 %v1121_v48 }
 0x719   : > { %v1123_v53 = vpop.xlane.xlu1 %1122 }
 0x71a   : > { %v1124_v54 = vmul.f32 0.03125, %v1123_v53 }
 0x71c   : > { %v1125_v55 = vadd.f32 1e-05, %v1124_v54 }
 0x71e   : > { %1692 = vrsqrt.f32 %v1125_v55 }
 0x728   : > { %v1693_v59 = vpop.eup %1692 }
 0x729   : > { %v1127_v60 = vmul.f32 %v1693_v59, %v1119_v46  ;;  %v1335_v46 = vsub.s32 7, %v1991_v10 }
 0x72b   : > { %v1132_v62 = vmul.f32 %v1131_v58, %v1127_v60  ;;  %v1336_v49 = vrot.slane %v1997_v12, %v1335_v46 }
 0x72d   : > { %v1137_v63 = vadd.f32 %v1136_v61, %v1132_v62 }
 0x72f   : > { %1562 = vmatmul.mubr.msk.f32.vlgmr.msra.gmra.mrb[12].mxu1 %vm277_vm1, %v1137_v63 }
 0x802   : > { %v1215_v19 = vpop.f32.mrb[12].mxu1 }
 0x803   : > { %v1216_v20 = vadd.f32 %v1215_v19, %v1145_v18  ;;  %v1563_v21 = vpop.f32.mrb[13].mxu1 }
 0x805   : > { %v1220_v22 = vmul.f32 0.044715, %v1216_v20  ;;  %v1219_v28 = vmul.f32 0.5, %v1216_v20 }
 0x807   : > { %v1221_v23 = vmul.f32 %v1220_v22, %v1216_v20 }
 0x809   : > { %v1222_v24 = vmul.f32 %v1221_v23, %v1216_v20 }
 0x80b   : > { %v1223_v25 = vadd.f32 %v1222_v24, %v1216_v20 }
 0x80d   : > { %v1224_v26 = vmul.f32 0.7978846, %v1223_v25 }
 0x80f   : > { %1694 = vtanh.f32 %v1224_v26 }
 0x819   : > { %v1695_v27 = vpop.eup %1694 }
 0x81a   : > { %v1226_v29 = vadd.f32 1.0, %v1695_v27 }
 0x81c   : > { %v1227_v30 = vmul.f32 %v1226_v29, %v1219_v28 }
 0x81e   : > { %1581 = vmatmul.mubr.msk.f32.vlgmr.msra.gmra.mrb[8].mxu0 %vm1240_vm5, %v1227_v30 }
 0x8f1   : > { %v1310_v32 = vpop.f32.mrb[8].mxu0 }
 0x8f2   : > { %v1311_v33 = vadd.f32 %v1310_v32, %v1239_v31  ;;  %v1582_v34 = vpop.f32.mrb[9].mxu0 }
 0x8f4   : > { %v1314_v35 = vadd.f32 %v1311_v33, %v1137_v63 }
 0x8f6   : > { %v1315_v36 = vsel %vm277_vm1, %v1314_v35, 0.0 }
 0x8f7   : > { %1316 = vadd.xlane.f32.xlu0 %v1315_v36 }
 0x984   : > { %v1317_v37 = vpop.xlane.xlu0 %1316 }
 0x985   : > { %v1318_v38 = vmul.f32 0.03125, %v1317_v37 }
 0x987   : > { %v1319_v39 = vsub.f32 %v1314_v35, %v1318_v38 }
 0x989   : > { %v1320_v40 = vmul.f32 %v1319_v39, %v1319_v39 }
 0x98b   : > { %v1321_v41 = vsel %vm277_vm1, %v1320_v40, 0.0 }
 0x98c   : > { %1322 = vadd.xlane.f32.xlu0 %v1321_v41 }
 0xa19   : > { %v1323_v42 = vpop.xlane.xlu0 %1322 }
 0xa1a   : > { %v1324_v43 = vmul.f32 0.03125, %v1323_v42 }
 0xa1c   : > { %v1325_v44 = vadd.f32 1e-05, %v1324_v43 }
 0xa1e   : > { %1696 = vrsqrt.f32 %v1325_v44 }
 0xa28   : > { %v1697_v48 = vpop.eup %1696 }
 0xa29   : > { %v1327_v1 = vmul.f32 %v1697_v48, %v1319_v39 }
 0xa2b   : > { %v1332_v50 = vmul.f32 %v1331_v47, %v1327_v1 }
 0xa2d   : > { %v1337_v8 = vadd.f32 %v1336_v49, %v1332_v50 }
 0xa2f   : > { %1338 = vst.msk [vmem:[%s266_s12] sm:$0xff] %vm277_vm1, %v1337_v8 }
 0xa30   : > { %1741 = shalt.err (!%p1738_p4)
}
 0xa31   : > { %s1742_s26 = scalar_lea.hbm %s2142_s15, 128  ;;  %s1746_s20 = scalar_lea.hbm %s2193_s6, 256 }
 0xa32   : > { %p1743_p5 = scmp.ne.s32.totalorder %s2142_s15, %s1742_s26  ;;  %p1747_p0 = scmp.lt.u32.totalorder %s2142_s15, %s2193_s6 }
 0xa33   : > { %p1748_p1 = scmp.lt.u32.totalorder %s1746_s20, %s1742_s26  ;;  %p1750_p6 = scmp.lt.u32.totalorder %s1742_s26, %s2142_s15 }
 0xa34   : > { %p1744_p8 = pnand %p1743_p5, %p2202_p11 }
 0xa35   : > { %p1749_p3 = por %p1748_p1, %p1747_p0 }
 0xa36   : > { %p1745_p9 = pneg %p1744_p8 }
 0xa37   : > { %p1751_p12 = por %p1750_p6, %p1749_p3 }
 0xa39   : > { %p1752_p13 = pnand %p1751_p12, %p1745_p9 }
 0xa3b   : > { %1755 = shalt.err (!%p1752_p13)
}
 0xa3c   : > { %1615 = dma.vmem_to_hbm [thread:$0]  (%p2202_p11), %s2144_s13, 128, %s2142_s15, %s1340_s17  }
 0xa3d PF: > { %s1365_s12 = sand.u32 1, %s1782_s21   ;;  %p2203_p7 = scmp.ne.s32.totalorder %s2198_s10, 0 }
 0xa3e   : > { %p2204_p10 = scmp.ge.s32.totalorder %s1794_s24, 2  ;;  %s1366_s11 = scalar_lea.sflag [#allocation4], %s1365_s12 }
 0xa40   : > { %p1622_p2 = pnand %p2204_p10, %p2203_p7 }
 0xa42   : > { %1777 = dma.done.wait (!%p1622_p2), %s1366_s11, 128  }
 0xa43   : > { %1779 = vsyncadd (!%p1622_p2), %s1366_s11, 4294967168  ;;  %p19_p4 = scmp.ge.s32.totalorder %s1875_s27, 4   ;;  %s2205_s21 = smov %s1786_s22 }
 0xa44   : > { %s2206_s22 = smov %s1790_s23  ;;  %s2207_s23 = smov %s1887_s30 }
 0xa45   : > { %s2208_s24 = smov %s1875_s27  ;;  %21 = sbr.rel (!%p19_p4) target bundleno = 5 (0x5), region = 89 }
 0xa4c   :  { %1371 = vsyncpa [#allocation3], 1 }
 0xa4d   :  { %1373 = vsyncpa [#allocation3 + $0x1], 1 }
 0xa4e   :  { %1374 = vsyncpa [#allocation4], 1 }
 0xa4f   :  { %1376 = vsyncpa [#allocation4 + $0x1], 1 }

</bundles_post_ra>
